<compile_context>
chip_gen: v7x
topology: tpu7x:2x2x1
jax: 0.10.0
libtpu: 0.0.40
codegen_flags: <defaults>
</compile_context>

<pallas_src>
import functools

import jax
import jax.numpy as jnp
from jax import lax
from jax.experimental import pallas as pl
from jax.experimental.pallas import tpu as pltpu


def _gru_fc_logsoftmax_kernel(emb_ref,     # (S, Bt, E) time-major embeddings
                              w_ih_t_ref,  # (E, 3H)  input->gates (transposed)
                              w_hh_t_ref,  # (H, 3H)  hidden->gates (transposed)
                              b_xg_ref,    # (1, 3H)  b_ih + [b_hh_r, b_hh_z, 0]
                              b_hn_ref,    # (1, H)   b_hh n-gate part
                              w_fc_t_ref,  # (H, O)   fc weight (transposed)
                              b_fc_ref,    # (1, O)
                              out_ref,     # (S, Bt, O) log-softmax output
                              *, seq_len, batch_tile, hidden_dim):
    S, Bt, H = seq_len, batch_tile, hidden_dim

    # --- all input projections in ONE large MXU matmul: (S*Bt, E) @ (E, 3H) ---
    # Bias already contains b_ih plus the r/z parts of b_hh (folded in wrapper).
    emb2d = emb_ref[...].reshape(S * Bt, -1)
    xp = jnp.dot(emb2d, w_ih_t_ref[...],
                 preferred_element_type=jnp.float32) + b_xg_ref[...]   # (S*Bt, 3H)

    # --- loop-invariant loads / broadcasts hoisted out of the recurrence -----
    w_hh_t = w_hh_t_ref[...]                                   # (H, 3H)
    b_hn = jnp.broadcast_to(b_hn_ref[...], (Bt, H))            # (Bt, H)

    # --- GRU recurrence (PyTorch gate order r, z, n); h stays in vregs -------
    # Statically unrolled: gives the LLO scheduler cross-step visibility.
    h = jnp.zeros((Bt, H), jnp.float32)
    hs = []
    for t in range(S):
        x_g = xp[t * Bt:(t + 1) * Bt, :]                       # (Bt, 3H) static slice
        h_g = jnp.dot(h, w_hh_t, preferred_element_type=jnp.float32)  # raw, no bias
        r = jax.nn.sigmoid(x_g[:, 0:H] + h_g[:, 0:H])
        z = jax.nn.sigmoid(x_g[:, H:2 * H] + h_g[:, H:2 * H])
        n = jnp.tanh(x_g[:, 2 * H:3 * H] + r * (h_g[:, 2 * H:3 * H] + b_hn))
        h = n + z * (h - n)                                    # == (1-z)*n + z*h
        hs.append(h)

    # --- FC + log_softmax on a single flattened (S*Bt, .) slab ---------------
    h_all = jnp.concatenate(hs, axis=0)                        # (S*Bt, H) time-major
    logits = jnp.dot(h_all, w_fc_t_ref[...],
                     preferred_element_type=jnp.float32) + b_fc_ref[...]  # (S*Bt, O)
    m = jnp.max(logits, axis=-1, keepdims=True)
    lse = jnp.log(jnp.sum(jnp.exp(logits - m), axis=-1, keepdims=True)) + m
    out_ref[...] = (logits - lse).reshape(S, Bt, -1)


def aspect_term_extractor_forward(x_ids, params, *, batch_tile=None):
    """x_ids: int32 (B, S) token ids. Returns log-probs (B, S, O) float32."""
    emb_table = params['embedding']                   # (V, E)
    w_ih, w_hh = params['w_ih'], params['w_hh']       # (3H, E), (3H, H)
    b_ih, b_hh = params['b_ih'], params['b_hh']       # (3H,),   (3H,)
    w_fc, b_fc = params['w_fc'], params['b_fc']       # (O, H),  (O,)

    B, S = x_ids.shape
    E = emb_table.shape[1]
    H = w_hh.shape[1]
    O = w_fc.shape[0]

    # Batch tile: must be the full batch or a multiple of 8 ((8,128) block rule).
    if batch_tile is None:
        batch_tile = 8 if (B % 8 == 0) else B
    assert B % batch_tile == 0

    # Embedding gather directly in time-major order (gather of transposed ids;
    # no transpose of the big (B,S,E) embedded tensor).
    emb_tm = jnp.take(emb_table, x_ids.T, axis=0).astype(jnp.float32)   # (S, B, E)

    # Fold the r/z parts of the hidden bias into the input-projection bias so
    # the recurrence only touches the (H,)-wide n-gate hidden bias.
    b_ih32 = b_ih.astype(jnp.float32)
    b_hh32 = b_hh.astype(jnp.float32)
    b_xg = b_ih32 + jnp.concatenate(
        [b_hh32[:2 * H], jnp.zeros((H,), jnp.float32)])        # (3H,)
    b_hn = b_hh32[2 * H:3 * H]                                  # (H,)

    kernel = functools.partial(_gru_fc_logsoftmax_kernel,
                               seq_len=S, batch_tile=batch_tile, hidden_dim=H)

    flops = (2 * S * B * E * 3 * H      # input projections
             + 2 * S * B * H * 3 * H    # recurrent projections
             + 2 * S * B * H * O        # fc
             + 12 * S * B * H)          # gate elementwise math
    transcendentals = S * B * (3 * H + O)
    bytes_accessed = 4 * (S * B * E + E * 3 * H + H * 3 * H + 4 * H
                          + H * O + O + S * B * O)

    out_tm = pl.pallas_call(
        kernel,
        out_shape=jax.ShapeDtypeStruct((S, B, O), jnp.float32),
        grid=(B // batch_tile,),
        in_specs=[
            pl.BlockSpec((S, batch_tile, E), lambda b: (0, b, 0)),
            pl.BlockSpec((E, 3 * H), lambda b: (0, 0)),
            pl.BlockSpec((H, 3 * H), lambda b: (0, 0)),
            pl.BlockSpec((1, 3 * H), lambda b: (0, 0)),
            pl.BlockSpec((1, H), lambda b: (0, 0)),
            pl.BlockSpec((H, O), lambda b: (0, 0)),
            pl.BlockSpec((1, O), lambda b: (0, 0)),
        ],
        out_specs=pl.BlockSpec((S, batch_tile, O), lambda b: (0, b, 0)),
        compiler_params=pltpu.CompilerParams(
            dimension_semantics=("parallel",),
            vmem_limit_bytes=32 * 1024 * 1024,
        ),
        cost_estimate=pl.CostEstimate(flops=flops,
                                      transcendentals=transcendentals,
                                      bytes_accessed=bytes_accessed),
    )(
        emb_tm,
        w_ih.T.astype(jnp.float32),            # (E, 3H)
        w_hh.T.astype(jnp.float32),            # (H, 3H)
        b_xg[None, :],                         # (1, 3H)
        b_hn[None, :],                         # (1, H)
        w_fc.T.astype(jnp.float32),            # (H, O)
        b_fc[None, :].astype(jnp.float32),     # (1, O)
    )
    # Tiny (S,B,O) -> (B,S,O) transpose (1 KiB at demo shapes).
    return jnp.transpose(out_tm, (1, 0, 2))


def reference_forward(x_ids, params):
    """Pure-JAX reference replicating PyTorch GRU/Linear/log_softmax (eval mode)."""
    emb = jnp.take(params['embedding'], x_ids, axis=0)     # (B, S, E)
    H = params['w_hh'].shape[1]
    w_ih_t = params['w_ih'].T
    w_hh_t = params['w_hh'].T
    b_ih, b_hh = params['b_ih'], params['b_hh']

    def cell(h_prev, x_t):
        x_g = x_t @ w_ih_t + b_ih
        h_g = h_prev @ w_hh_t + b_hh
        r = jax.nn.sigmoid(x_g[:, 0:H] + h_g[:, 0:H])
        z = jax.nn.sigmoid(x_g[:, H:2 * H] + h_g[:, H:2 * H])
        n = jnp.tanh(x_g[:, 2 * H:3 * H] + r * h_g[:, 2 * H:3 * H])
        h_new = (1.0 - z) * n + z * h_prev
        return h_new, h_new

    B = x_ids.shape[0]
    h0 = jnp.zeros((B, H), jnp.float32)
    _, hs = lax.scan(cell, h0, jnp.transpose(emb, (1, 0, 2)))   # (S, B, H)
    hs = jnp.transpose(hs, (1, 0, 2))                            # (B, S, H)
    logits = hs @ params['w_fc'].T + params['b_fc']
    return jax.nn.log_softmax(logits, axis=2)


def make_params(key, vocab_size, embedding_dim, hidden_dim, output_dim):
    ks = jax.random.split(key, 7)
    s = 0.1
    return {
        'embedding': jax.random.normal(ks[0], (vocab_size, embedding_dim), jnp.float32),
        'w_ih': s * jax.random.normal(ks[1], (3 * hidden_dim, embedding_dim), jnp.float32),
        'w_hh': s * jax.random.normal(ks[2], (3 * hidden_dim, hidden_dim), jnp.float32),
        'b_ih': s * jax.random.normal(ks[3], (3 * hidden_dim,), jnp.float32),
        'b_hh': s * jax.random.normal(ks[4], (3 * hidden_dim,), jnp.float32),
        'w_fc': s * jax.random.normal(ks[5], (output_dim, hidden_dim), jnp.float32),
        'b_fc': s * jax.random.normal(ks[6], (output_dim,), jnp.float32),
    }


if __name__ == "__main__":
    VOCAB, EMB, HID, OUT = 50, 32, 32, 8
    BATCH, SEQ = 2, 8

    key = jax.random.PRNGKey(0)
    pkey, xkey = jax.random.split(key)
    params = make_params(pkey, VOCAB, EMB, HID, OUT)
    x_ids = jax.random.randint(xkey, (BATCH, SEQ), 0, VOCAB, dtype=jnp.int32)

    out = aspect_term_extractor_forward(x_ids, params)
    out = jax.block_until_ready(out)

    ref = jax.block_until_ready(reference_forward(x_ids, params))
    assert out.shape == (BATCH, SEQ, OUT)
    assert jnp.all(jnp.isfinite(out))
    assert jnp.allclose(out, ref, atol=1e-4, rtol=1e-4)

    print("KERNEL_OK")
</pallas_src>

<mosaic_0001>
module attributes {stable_mosaic.version = 11 : i64} {
  func.func @_gru_fc_logsoftmax_kernel(%arg0: i32, %arg1: memref<8x2x32xf32, #tpu.memory_space<vmem>>, %arg2: memref<32x96xf32, #tpu.memory_space<vmem>>, %arg3: memref<32x96xf32, #tpu.memory_space<vmem>>, %arg4: memref<1x96xf32, #tpu.memory_space<vmem>>, %arg5: memref<1x32xf32, #tpu.memory_space<vmem>>, %arg6: memref<32x8xf32, #tpu.memory_space<vmem>>, %arg7: memref<1x8xf32, #tpu.memory_space<vmem>>, %arg8: memref<8x2x8xf32, #tpu.memory_space<vmem>>) attributes {dimension_semantics = [#tpu.dimension_semantics<parallel>], iteration_bounds = array<i64: 1>, scalar_prefetch = 0 : i64, scratch_operands = 0 : i64, tpu.core_type = #tpu.core_type<tc>, window_params = [{transform_indices = @transform_0, window_bounds = array<i64: 8, 2, 32>}, {pipeline_mode = #tpu.pipeline_mode<synchronous>, transform_indices = @transform_1, window_bounds = array<i64: 32, 96>}, {pipeline_mode = #tpu.pipeline_mode<synchronous>, transform_indices = @transform_2, window_bounds = array<i64: 32, 96>}, {pipeline_mode = #tpu.pipeline_mode<synchronous>, transform_indices = @transform_3, window_bounds = array<i64: 1, 96>}, {pipeline_mode = #tpu.pipeline_mode<synchronous>, transform_indices = @transform_4, window_bounds = array<i64: 1, 32>}, {pipeline_mode = #tpu.pipeline_mode<synchronous>, transform_indices = @transform_5, window_bounds = array<i64: 32, 8>}, {pipeline_mode = #tpu.pipeline_mode<synchronous>, transform_indices = @transform_6, window_bounds = array<i64: 1, 8>}, {transform_indices = @transform_7, window_bounds = array<i64: 8, 2, 8>}]} {
    %c0 = arith.constant 0 : index
    %c0_0 = arith.constant 0 : index
    %c0_1 = arith.constant 0 : index
    %0 = vector.load %arg1[%c0, %c0_0, %c0_1] : memref<8x2x32xf32, #tpu.memory_space<vmem>>, vector<8x2x32xf32>
    %1 = vector.shape_cast %0 : vector<8x2x32xf32> to vector<16x32xf32>
    %c0_2 = arith.constant 0 : index
    %c0_3 = arith.constant 0 : index
    %2 = vector.load %arg2[%c0_2, %c0_3] : memref<32x96xf32, #tpu.memory_space<vmem>>, vector<32x96xf32>
    %cst = arith.constant dense<0.000000e+00> : vector<16x96xf32>
    %3 = tpu.matmul %1, %2, %cst {dimension_numbers = #tpu.dot_dimension_numbers<[1], [0], [0], [1], [0, 0, 1, 1], [], []>} : vector<16x32xf32>, vector<32x96xf32>, vector<16x96xf32> -> vector<16x96xf32>
    %c0_4 = arith.constant 0 : index
    %c0_5 = arith.constant 0 : index
    %4 = vector.load %arg4[%c0_4, %c0_5] : memref<1x96xf32, #tpu.memory_space<vmem>>, vector<1x96xf32>
    %5 = vector.broadcast %4 : vector<1x96xf32> to vector<16x96xf32>
    %6 = arith.addf %3, %5 : vector<16x96xf32>
    %c0_6 = arith.constant 0 : index
    %c0_7 = arith.constant 0 : index
    %7 = vector.load %arg3[%c0_6, %c0_7] : memref<32x96xf32, #tpu.memory_space<vmem>>, vector<32x96xf32>
    %c0_8 = arith.constant 0 : index
    %c0_9 = arith.constant 0 : index
    %8 = vector.load %arg5[%c0_8, %c0_9] : memref<1x32xf32, #tpu.memory_space<vmem>>, vector<1x32xf32>
    %9 = vector.shape_cast %8 : vector<1x32xf32> to vector<1x32xf32>
    %10 = vector.broadcast %9 : vector<1x32xf32> to vector<2x32xf32>
    %cst_10 = arith.constant 0.000000e+00 : f32
    %11 = vector.broadcast %cst_10 : f32 to vector<2x32xf32>
    %12 = vector.extract_strided_slice %6 {offsets = [0, 0], sizes = [2, 96], strides = [1, 1]} : vector<16x96xf32> to vector<2x96xf32>
    %cst_11 = arith.constant dense<0.000000e+00> : vector<2x96xf32>
    %13 = tpu.matmul %11, %7, %cst_11 {dimension_numbers = #tpu.dot_dimension_numbers<[1], [0], [0], [1], [0, 0, 1, 1], [], []>} : vector<2x32xf32>, vector<32x96xf32>, vector<2x96xf32> -> vector<2x96xf32>
    %14 = vector.extract_strided_slice %12 {offsets = [0, 0], sizes = [2, 32], strides = [1, 1]} : vector<2x96xf32> to vector<2x32xf32>
    %15 = vector.extract_strided_slice %13 {offsets = [0, 0], sizes = [2, 32], strides = [1, 1]} : vector<2x96xf32> to vector<2x32xf32>
    %16 = arith.addf %14, %15 : vector<2x32xf32>
    %17 = arith.negf %16 : vector<2x32xf32>
    %18 = math.exp %17 : vector<2x32xf32>
    %cst_12 = arith.constant 1.000000e+00 : f32
    %19 = vector.broadcast %cst_12 : f32 to vector<2x32xf32>
    %20 = arith.addf %19, %18 : vector<2x32xf32>
    %21 = arith.divf %19, %20 : vector<2x32xf32>
    %22 = vector.extract_strided_slice %12 {offsets = [0, 32], sizes = [2, 32], strides = [1, 1]} : vector<2x96xf32> to vector<2x32xf32>
    %23 = vector.extract_strided_slice %13 {offsets = [0, 32], sizes = [2, 32], strides = [1, 1]} : vector<2x96xf32> to vector<2x32xf32>
    %24 = arith.addf %22, %23 : vector<2x32xf32>
    %25 = arith.negf %24 : vector<2x32xf32>
    %26 = math.exp %25 : vector<2x32xf32>
    %cst_13 = arith.constant 1.000000e+00 : f32
    %27 = vector.broadcast %cst_13 : f32 to vector<2x32xf32>
    %28 = arith.addf %27, %26 : vector<2x32xf32>
    %29 = arith.divf %27, %28 : vector<2x32xf32>
    %30 = vector.extract_strided_slice %12 {offsets = [0, 64], sizes = [2, 32], strides = [1, 1]} : vector<2x96xf32> to vector<2x32xf32>
    %31 = vector.extract_strided_slice %13 {offsets = [0, 64], sizes = [2, 32], strides = [1, 1]} : vector<2x96xf32> to vector<2x32xf32>
    %32 = arith.addf %31, %10 : vector<2x32xf32>
    %33 = arith.mulf %21, %32 : vector<2x32xf32>
    %34 = arith.addf %30, %33 : vector<2x32xf32>
    %35 = math.tanh %34 : vector<2x32xf32>
    %36 = arith.subf %11, %35 : vector<2x32xf32>
    %37 = arith.mulf %29, %36 : vector<2x32xf32>
    %38 = arith.addf %35, %37 : vector<2x32xf32>
    %39 = vector.extract_strided_slice %6 {offsets = [2, 0], sizes = [2, 96], strides = [1, 1]} : vector<16x96xf32> to vector<2x96xf32>
    %cst_14 = arith.constant dense<0.000000e+00> : vector<2x96xf32>
    %40 = tpu.matmul %38, %7, %cst_14 {dimension_numbers = #tpu.dot_dimension_numbers<[1], [0], [0], [1], [0, 0, 1, 1], [], []>} : vector<2x32xf32>, vector<32x96xf32>, vector<2x96xf32> -> vector<2x96xf32>
    %41 = vector.extract_strided_slice %39 {offsets = [0, 0], sizes = [2, 32], strides = [1, 1]} : vector<2x96xf32> to vector<2x32xf32>
    %42 = vector.extract_strided_slice %40 {offsets = [0, 0], sizes = [2, 32], strides = [1, 1]} : vector<2x96xf32> to vector<2x32xf32>
    %43 = arith.addf %41, %42 : vector<2x32xf32>
    %44 = arith.negf %43 : vector<2x32xf32>
    %45 = math.exp %44 : vector<2x32xf32>
    %cst_15 = arith.constant 1.000000e+00 : f32
    %46 = vector.broadcast %cst_15 : f32 to vector<2x32xf32>
    %47 = arith.addf %46, %45 : vector<2x32xf32>
    %48 = arith.divf %46, %47 : vector<2x32xf32>
    %49 = vector.extract_strided_slice %39 {offsets = [0, 32], sizes = [2, 32], strides = [1, 1]} : vector<2x96xf32> to vector<2x32xf32>
    %50 = vector.extract_strided_slice %40 {offsets = [0, 32], sizes = [2, 32], strides = [1, 1]} : vector<2x96xf32> to vector<2x32xf32>
    %51 = arith.addf %49, %50 : vector<2x32xf32>
    %52 = arith.negf %51 : vector<2x32xf32>
    %53 = math.exp %52 : vector<2x32xf32>
    %cst_16 = arith.constant 1.000000e+00 : f32
    %54 = vector.broadcast %cst_16 : f32 to vector<2x32xf32>
    %55 = arith.addf %54, %53 : vector<2x32xf32>
    %56 = arith.divf %54, %55 : vector<2x32xf32>
    %57 = vector.extract_strided_slice %39 {offsets = [0, 64], sizes = [2, 32], strides = [1, 1]} : vector<2x96xf32> to vector<2x32xf32>
    %58 = vector.extract_strided_slice %40 {offsets = [0, 64], sizes = [2, 32], strides = [1, 1]} : vector<2x96xf32> to vector<2x32xf32>
    %59 = arith.addf %58, %10 : vector<2x32xf32>
    %60 = arith.mulf %48, %59 : vector<2x32xf32>
    %61 = arith.addf %57, %60 : vector<2x32xf32>
    %62 = math.tanh %61 : vector<2x32xf32>
    %63 = arith.subf %38, %62 : vector<2x32xf32>
    %64 = arith.mulf %56, %63 : vector<2x32xf32>
    %65 = arith.addf %62, %64 : vector<2x32xf32>
    %66 = vector.extract_strided_slice %6 {offsets = [4, 0], sizes = [2, 96], strides = [1, 1]} : vector<16x96xf32> to vector<2x96xf32>
    %cst_17 = arith.constant dense<0.000000e+00> : vector<2x96xf32>
    %67 = tpu.matmul %65, %7, %cst_17 {dimension_numbers = #tpu.dot_dimension_numbers<[1], [0], [0], [1], [0, 0, 1, 1], [], []>} : vector<2x32xf32>, vector<32x96xf32>, vector<2x96xf32> -> vector<2x96xf32>
    %68 = vector.extract_strided_slice %66 {offsets = [0, 0], sizes = [2, 32], strides = [1, 1]} : vector<2x96xf32> to vector<2x32xf32>
    %69 = vector.extract_strided_slice %67 {offsets = [0, 0], sizes = [2, 32], strides = [1, 1]} : vector<2x96xf32> to vector<2x32xf32>
    %70 = arith.addf %68, %69 : vector<2x32xf32>
    %71 = arith.negf %70 : vector<2x32xf32>
    %72 = math.exp %71 : vector<2x32xf32>
    %cst_18 = arith.constant 1.000000e+00 : f32
    %73 = vector.broadcast %cst_18 : f32 to vector<2x32xf32>
    %74 = arith.addf %73, %72 : vector<2x32xf32>
    %75 = arith.divf %73, %74 : vector<2x32xf32>
    %76 = vector.extract_strided_slice %66 {offsets = [0, 32], sizes = [2, 32], strides = [1, 1]} : vector<2x96xf32> to vector<2x32xf32>
    %77 = vector.extract_strided_slice %67 {offsets = [0, 32], sizes = [2, 32], strides = [1, 1]} : vector<2x96xf32> to vector<2x32xf32>
    %78 = arith.addf %76, %77 : vector<2x32xf32>
    %79 = arith.negf %78 : vector<2x32xf32>
    %80 = math.exp %79 : vector<2x32xf32>
    %cst_19 = arith.constant 1.000000e+00 : f32
    %81 = vector.broadcast %cst_19 : f32 to vector<2x32xf32>
    %82 = arith.addf %81, %80 : vector<2x32xf32>
    %83 = arith.divf %81, %82 : vector<2x32xf32>
    %84 = vector.extract_strided_slice %66 {offsets = [0, 64], sizes = [2, 32], strides = [1, 1]} : vector<2x96xf32> to vector<2x32xf32>
    %85 = vector.extract_strided_slice %67 {offsets = [0, 64], sizes = [2, 32], strides = [1, 1]} : vector<2x96xf32> to vector<2x32xf32>
    %86 = arith.addf %85, %10 : vector<2x32xf32>
    %87 = arith.mulf %75, %86 : vector<2x32xf32>
    %88 = arith.addf %84, %87 : vector<2x32xf32>
    %89 = math.tanh %88 : vector<2x32xf32>
    %90 = arith.subf %65, %89 : vector<2x32xf32>
    %91 = arith.mulf %83, %90 : vector<2x32xf32>
    %92 = arith.addf %89, %91 : vector<2x32xf32>
    %93 = vector.extract_strided_slice %6 {offsets = [6, 0], sizes = [2, 96], strides = [1, 1]} : vector<16x96xf32> to vector<2x96xf32>
    %cst_20 = arith.constant dense<0.000000e+00> : vector<2x96xf32>
    %94 = tpu.matmul %92, %7, %cst_20 {dimension_numbers = #tpu.dot_dimension_numbers<[1], [0], [0], [1], [0, 0, 1, 1], [], []>} : vector<2x32xf32>, vector<32x96xf32>, vector<2x96xf32> -> vector<2x96xf32>
    %95 = vector.extract_strided_slice %93 {offsets = [0, 0], sizes = [2, 32], strides = [1, 1]} : vector<2x96xf32> to vector<2x32xf32>
    %96 = vector.extract_strided_slice %94 {offsets = [0, 0], sizes = [2, 32], strides = [1, 1]} : vector<2x96xf32> to vector<2x32xf32>
    %97 = arith.addf %95, %96 : vector<2x32xf32>
    %98 = arith.negf %97 : vector<2x32xf32>
    %99 = math.exp %98 : vector<2x32xf32>
    %cst_21 = arith.constant 1.000000e+00 : f32
    %100 = vector.broadcast %cst_21 : f32 to vector<2x32xf32>
    %101 = arith.addf %100, %99 : vector<2x32xf32>
    %102 = arith.divf %100, %101 : vector<2x32xf32>
    %103 = vector.extract_strided_slice %93 {offsets = [0, 32], sizes = [2, 32], strides = [1, 1]} : vector<2x96xf32> to vector<2x32xf32>
    %104 = vector.extract_strided_slice %94 {offsets = [0, 32], sizes = [2, 32], strides = [1, 1]} : vector<2x96xf32> to vector<2x32xf32>
    %105 = arith.addf %103, %104 : vector<2x32xf32>
    %106 = arith.negf %105 : vector<2x32xf32>
    %107 = math.exp %106 : vector<2x32xf32>
    %cst_22 = arith.constant 1.000000e+00 : f32
    %108 = vector.broadcast %cst_22 : f32 to vector<2x32xf32>
    %109 = arith.addf %108, %107 : vector<2x32xf32>
    %110 = arith.divf %108, %109 : vector<2x32xf32>
    %111 = vector.extract_strided_slice %93 {offsets = [0, 64], sizes = [2, 32], strides = [1, 1]} : vector<2x96xf32> to vector<2x32xf32>
    %112 = vector.extract_strided_slice %94 {offsets = [0, 64], sizes = [2, 32], strides = [1, 1]} : vector<2x96xf32> to vector<2x32xf32>
    %113 = arith.addf %112, %10 : vector<2x32xf32>
    %114 = arith.mulf %102, %113 : vector<2x32xf32>
    %115 = arith.addf %111, %114 : vector<2x32xf32>
    %116 = math.tanh %115 : vector<2x32xf32>
    %117 = arith.subf %92, %116 : vector<2x32xf32>
    %118 = arith.mulf %110, %117 : vector<2x32xf32>
    %119 = arith.addf %116, %118 : vector<2x32xf32>
    %120 = vector.extract_strided_slice %6 {offsets = [8, 0], sizes = [2, 96], strides = [1, 1]} : vector<16x96xf32> to vector<2x96xf32>
    %cst_23 = arith.constant dense<0.000000e+00> : vector<2x96xf32>
    %121 = tpu.matmul %119, %7, %cst_23 {dimension_numbers = #tpu.dot_dimension_numbers<[1], [0], [0], [1], [0, 0, 1, 1], [], []>} : vector<2x32xf32>, vector<32x96xf32>, vector<2x96xf32> -> vector<2x96xf32>
    %122 = vector.extract_strided_slice %120 {offsets = [0, 0], sizes = [2, 32], strides = [1, 1]} : vector<2x96xf32> to vector<2x32xf32>
    %123 = vector.extract_strided_slice %121 {offsets = [0, 0], sizes = [2, 32], strides = [1, 1]} : vector<2x96xf32> to vector<2x32xf32>
    %124 = arith.addf %122, %123 : vector<2x32xf32>
    %125 = arith.negf %124 : vector<2x32xf32>
    %126 = math.exp %125 : vector<2x32xf32>
    %cst_24 = arith.constant 1.000000e+00 : f32
    %127 = vector.broadcast %cst_24 : f32 to vector<2x32xf32>
    %128 = arith.addf %127, %126 : vector<2x32xf32>
    %129 = arith.divf %127, %128 : vector<2x32xf32>
    %130 = vector.extract_strided_slice %120 {offsets = [0, 32], sizes = [2, 32], strides = [1, 1]} : vector<2x96xf32> to vector<2x32xf32>
    %131 = vector.extract_strided_slice %121 {offsets = [0, 32], sizes = [2, 32], strides = [1, 1]} : vector<2x96xf32> to vector<2x32xf32>
    %132 = arith.addf %130, %131 : vector<2x32xf32>
    %133 = arith.negf %132 : vector<2x32xf32>
    %134 = math.exp %133 : vector<2x32xf32>
    %cst_25 = arith.constant 1.000000e+00 : f32
    %135 = vector.broadcast %cst_25 : f32 to vector<2x32xf32>
    %136 = arith.addf %135, %134 : vector<2x32xf32>
    %137 = arith.divf %135, %136 : vector<2x32xf32>
    %138 = vector.extract_strided_slice %120 {offsets = [0, 64], sizes = [2, 32], strides = [1, 1]} : vector<2x96xf32> to vector<2x32xf32>
    %139 = vector.extract_strided_slice %121 {offsets = [0, 64], sizes = [2, 32], strides = [1, 1]} : vector<2x96xf32> to vector<2x32xf32>
    %140 = arith.addf %139, %10 : vector<2x32xf32>
    %141 = arith.mulf %129, %140 : vector<2x32xf32>
    %142 = arith.addf %138, %141 : vector<2x32xf32>
    %143 = math.tanh %142 : vector<2x32xf32>
    %144 = arith.subf %119, %143 : vector<2x32xf32>
    %145 = arith.mulf %137, %144 : vector<2x32xf32>
    %146 = arith.addf %143, %145 : vector<2x32xf32>
    %147 = vector.extract_strided_slice %6 {offsets = [10, 0], sizes = [2, 96], strides = [1, 1]} : vector<16x96xf32> to vector<2x96xf32>
    %cst_26 = arith.constant dense<0.000000e+00> : vector<2x96xf32>
    %148 = tpu.matmul %146, %7, %cst_26 {dimension_numbers = #tpu.dot_dimension_numbers<[1], [0], [0], [1], [0, 0, 1, 1], [], []>} : vector<2x32xf32>, vector<32x96xf32>, vector<2x96xf32> -> vector<2x96xf32>
    %149 = vector.extract_strided_slice %147 {offsets = [0, 0], sizes = [2, 32], strides = [1, 1]} : vector<2x96xf32> to vector<2x32xf32>
    %150 = vector.extract_strided_slice %148 {offsets = [0, 0], sizes = [2, 32], strides = [1, 1]} : vector<2x96xf32> to vector<2x32xf32>
    %151 = arith.addf %149, %150 : vector<2x32xf32>
    %152 = arith.negf %151 : vector<2x32xf32>
    %153 = math.exp %152 : vector<2x32xf32>
    %cst_27 = arith.constant 1.000000e+00 : f32
    %154 = vector.broadcast %cst_27 : f32 to vector<2x32xf32>
    %155 = arith.addf %154, %153 : vector<2x32xf32>
    %156 = arith.divf %154, %155 : vector<2x32xf32>
    %157 = vector.extract_strided_slice %147 {offsets = [0, 32], sizes = [2, 32], strides = [1, 1]} : vector<2x96xf32> to vector<2x32xf32>
    %158 = vector.extract_strided_slice %148 {offsets = [0, 32], sizes = [2, 32], strides = [1, 1]} : vector<2x96xf32> to vector<2x32xf32>
    %159 = arith.addf %157, %158 : vector<2x32xf32>
    %160 = arith.negf %159 : vector<2x32xf32>
    %161 = math.exp %160 : vector<2x32xf32>
    %cst_28 = arith.constant 1.000000e+00 : f32
    %162 = vector.broadcast %cst_28 : f32 to vector<2x32xf32>
    %163 = arith.addf %162, %161 : vector<2x32xf32>
    %164 = arith.divf %162, %163 : vector<2x32xf32>
    %165 = vector.extract_strided_slice %147 {offsets = [0, 64], sizes = [2, 32], strides = [1, 1]} : vector<2x96xf32> to vector<2x32xf32>
    %166 = vector.extract_strided_slice %148 {offsets = [0, 64], sizes = [2, 32], strides = [1, 1]} : vector<2x96xf32> to vector<2x32xf32>
    %167 = arith.addf %166, %10 : vector<2x32xf32>
    %168 = arith.mulf %156, %167 : vector<2x32xf32>
    %169 = arith.addf %165, %168 : vector<2x32xf32>
    %170 = math.tanh %169 : vector<2x32xf32>
    %171 = arith.subf %146, %170 : vector<2x32xf32>
    %172 = arith.mulf %164, %171 : vector<2x32xf32>
    %173 = arith.addf %170, %172 : vector<2x32xf32>
    %174 = vector.extract_strided_slice %6 {offsets = [12, 0], sizes = [2, 96], strides = [1, 1]} : vector<16x96xf32> to vector<2x96xf32>
    %cst_29 = arith.constant dense<0.000000e+00> : vector<2x96xf32>
    %175 = tpu.matmul %173, %7, %cst_29 {dimension_numbers = #tpu.dot_dimension_numbers<[1], [0], [0], [1], [0, 0, 1, 1], [], []>} : vector<2x32xf32>, vector<32x96xf32>, vector<2x96xf32> -> vector<2x96xf32>
    %176 = vector.extract_strided_slice %174 {offsets = [0, 0], sizes = [2, 32], strides = [1, 1]} : vector<2x96xf32> to vector<2x32xf32>
    %177 = vector.extract_strided_slice %175 {offsets = [0, 0], sizes = [2, 32], strides = [1, 1]} : vector<2x96xf32> to vector<2x32xf32>
    %178 = arith.addf %176, %177 : vector<2x32xf32>
    %179 = arith.negf %178 : vector<2x32xf32>
    %180 = math.exp %179 : vector<2x32xf32>
    %cst_30 = arith.constant 1.000000e+00 : f32
    %181 = vector.broadcast %cst_30 : f32 to vector<2x32xf32>
    %182 = arith.addf %181, %180 : vector<2x32xf32>
    %183 = arith.divf %181, %182 : vector<2x32xf32>
    %184 = vector.extract_strided_slice %174 {offsets = [0, 32], sizes = [2, 32], strides = [1, 1]} : vector<2x96xf32> to vector<2x32xf32>
    %185 = vector.extract_strided_slice %175 {offsets = [0, 32], sizes = [2, 32], strides = [1, 1]} : vector<2x96xf32> to vector<2x32xf32>
    %186 = arith.addf %184, %185 : vector<2x32xf32>
    %187 = arith.negf %186 : vector<2x32xf32>
    %188 = math.exp %187 : vector<2x32xf32>
    %cst_31 = arith.constant 1.000000e+00 : f32
    %189 = vector.broadcast %cst_31 : f32 to vector<2x32xf32>
    %190 = arith.addf %189, %188 : vector<2x32xf32>
    %191 = arith.divf %189, %190 : vector<2x32xf32>
    %192 = vector.extract_strided_slice %174 {offsets = [0, 64], sizes = [2, 32], strides = [1, 1]} : vector<2x96xf32> to vector<2x32xf32>
    %193 = vector.extract_strided_slice %175 {offsets = [0, 64], sizes = [2, 32], strides = [1, 1]} : vector<2x96xf32> to vector<2x32xf32>
    %194 = arith.addf %193, %10 : vector<2x32xf32>
    %195 = arith.mulf %183, %194 : vector<2x32xf32>
    %196 = arith.addf %192, %195 : vector<2x32xf32>
    %197 = math.tanh %196 : vector<2x32xf32>
    %198 = arith.subf %173, %197 : vector<2x32xf32>
    %199 = arith.mulf %191, %198 : vector<2x32xf32>
    %200 = arith.addf %197, %199 : vector<2x32xf32>
    %201 = vector.extract_strided_slice %6 {offsets = [14, 0], sizes = [2, 96], strides = [1, 1]} : vector<16x96xf32> to vector<2x96xf32>
    %cst_32 = arith.constant dense<0.000000e+00> : vector<2x96xf32>
    %202 = tpu.matmul %200, %7, %cst_32 {dimension_numbers = #tpu.dot_dimension_numbers<[1], [0], [0], [1], [0, 0, 1, 1], [], []>} : vector<2x32xf32>, vector<32x96xf32>, vector<2x96xf32> -> vector<2x96xf32>
    %203 = vector.extract_strided_slice %201 {offsets = [0, 0], sizes = [2, 32], strides = [1, 1]} : vector<2x96xf32> to vector<2x32xf32>
    %204 = vector.extract_strided_slice %202 {offsets = [0, 0], sizes = [2, 32], strides = [1, 1]} : vector<2x96xf32> to vector<2x32xf32>
    %205 = arith.addf %203, %204 : vector<2x32xf32>
    %206 = arith.negf %205 : vector<2x32xf32>
    %207 = math.exp %206 : vector<2x32xf32>
    %cst_33 = arith.constant 1.000000e+00 : f32
    %208 = vector.broadcast %cst_33 : f32 to vector<2x32xf32>
    %209 = arith.addf %208, %207 : vector<2x32xf32>
    %210 = arith.divf %208, %209 : vector<2x32xf32>
    %211 = vector.extract_strided_slice %201 {offsets = [0, 32], sizes = [2, 32], strides = [1, 1]} : vector<2x96xf32> to vector<2x32xf32>
    %212 = vector.extract_strided_slice %202 {offsets = [0, 32], sizes = [2, 32], strides = [1, 1]} : vector<2x96xf32> to vector<2x32xf32>
    %213 = arith.addf %211, %212 : vector<2x32xf32>
    %214 = arith.negf %213 : vector<2x32xf32>
    %215 = math.exp %214 : vector<2x32xf32>
    %cst_34 = arith.constant 1.000000e+00 : f32
    %216 = vector.broadcast %cst_34 : f32 to vector<2x32xf32>
    %217 = arith.addf %216, %215 : vector<2x32xf32>
    %218 = arith.divf %216, %217 : vector<2x32xf32>
    %219 = vector.extract_strided_slice %201 {offsets = [0, 64], sizes = [2, 32], strides = [1, 1]} : vector<2x96xf32> to vector<2x32xf32>
    %220 = vector.extract_strided_slice %202 {offsets = [0, 64], sizes = [2, 32], strides = [1, 1]} : vector<2x96xf32> to vector<2x32xf32>
    %221 = arith.addf %220, %10 : vector<2x32xf32>
    %222 = arith.mulf %210, %221 : vector<2x32xf32>
    %223 = arith.addf %219, %222 : vector<2x32xf32>
    %224 = math.tanh %223 : vector<2x32xf32>
    %225 = arith.subf %200, %224 : vector<2x32xf32>
    %226 = arith.mulf %218, %225 : vector<2x32xf32>
    %227 = arith.addf %224, %226 : vector<2x32xf32>
    %228 = tpu.concatenate %38, %65, %92, %119, %146, %173, %200, %227 in 0 : vector<2x32xf32>, vector<2x32xf32>, vector<2x32xf32>, vector<2x32xf32>, vector<2x32xf32>, vector<2x32xf32>, vector<2x32xf32>, vector<2x32xf32> -> vector<16x32xf32>
    %c0_35 = arith.constant 0 : index
    %c0_36 = arith.constant 0 : index
    %229 = vector.load %arg6[%c0_35, %c0_36] : memref<32x8xf32, #tpu.memory_space<vmem>>, vector<32x8xf32>
    %cst_37 = arith.constant dense<0.000000e+00> : vector<16x8xf32>
    %230 = tpu.matmul %228, %229, %cst_37 {dimension_numbers = #tpu.dot_dimension_numbers<[1], [0], [0], [1], [0, 0, 1, 1], [], []>} : vector<16x32xf32>, vector<32x8xf32>, vector<16x8xf32> -> vector<16x8xf32>
    %c0_38 = arith.constant 0 : index
    %c0_39 = arith.constant 0 : index
    %231 = vector.load %arg7[%c0_38, %c0_39] : memref<1x8xf32, #tpu.memory_space<vmem>>, vector<1x8xf32>
    %232 = vector.broadcast %231 : vector<1x8xf32> to vector<16x8xf32>
    %233 = arith.addf %230, %232 : vector<16x8xf32>
    %cst_40 = arith.constant dense<0xFF800000> : vector<16xf32>
    %234 = vector.multi_reduction <maximumf>, %233, %cst_40 [1] : vector<16x8xf32> to vector<16xf32>
    %235 = vector.shape_cast %234 : vector<16xf32> to vector<16x1xf32>
    %236 = vector.broadcast %235 : vector<16x1xf32> to vector<16x8xf32>
    %237 = arith.subf %233, %236 : vector<16x8xf32>
    %238 = math.exp %237 : vector<16x8xf32>
    %cst_41 = arith.constant dense<0.000000e+00> : vector<16xf32>
    %239 = vector.multi_reduction <add>, %238, %cst_41 [1] : vector<16x8xf32> to vector<16xf32>
    %240 = vector.shape_cast %239 : vector<16xf32> to vector<16x1xf32>
    %241 = math.log %240 : vector<16x1xf32>
    %242 = arith.addf %241, %235 : vector<16x1xf32>
    %243 = vector.broadcast %242 : vector<16x1xf32> to vector<16x8xf32>
    %244 = arith.subf %233, %243 : vector<16x8xf32>
    %245 = vector.shape_cast %244 : vector<16x8xf32> to vector<8x2x8xf32>
    %c0_42 = arith.constant 0 : index
    %c0_43 = arith.constant 0 : index
    %c0_44 = arith.constant 0 : index
    %246 = vector.load %arg8[%c0_42, %c0_43, %c0_44] : memref<8x2x8xf32, #tpu.memory_space<vmem>>, vector<8x2x8xf32>
    tpu.vector_store %arg8[%c0_42, %c0_43, %c0_44], %245 {strides = array<i32>} : memref<8x2x8xf32, #tpu.memory_space<vmem>>, vector<8x2x8xf32>,
    return
  }
  func.func @transform_0(%arg0: i32) -> (i32, i32, i32) {
    %c0_i32 = arith.constant 0 : i32
    %c0_i32_0 = arith.constant 0 : i32
    %c0_i32_1 = arith.constant 0 : i32
    return %c0_i32, %arg0, %c0_i32_0 : i32, i32, i32
  }
  func.func @transform_1(%arg0: i32) -> (i32, i32) {
    %c0_i32 = arith.constant 0 : i32
    %c0_i32_0 = arith.constant 0 : i32
    %c0_i32_1 = arith.constant 0 : i32
    return %c0_i32, %c0_i32_0 : i32, i32
  }
  func.func @transform_2(%arg0: i32) -> (i32, i32) {
    %c0_i32 = arith.constant 0 : i32
    %c0_i32_0 = arith.constant 0 : i32
    %c0_i32_1 = arith.constant 0 : i32
    return %c0_i32, %c0_i32_0 : i32, i32
  }
  func.func @transform_3(%arg0: i32) -> (i32, i32) {
    %c0_i32 = arith.constant 0 : i32
    %c0_i32_0 = arith.constant 0 : i32
    %c0_i32_1 = arith.constant 0 : i32
    return %c0_i32, %c0_i32_0 : i32, i32
  }
  func.func @transform_4(%arg0: i32) -> (i32, i32) {
    %c0_i32 = arith.constant 0 : i32
    %c0_i32_0 = arith.constant 0 : i32
    %c0_i32_1 = arith.constant 0 : i32
    return %c0_i32, %c0_i32_0 : i32, i32
  }
  func.func @transform_5(%arg0: i32) -> (i32, i32) {
    %c0_i32 = arith.constant 0 : i32
    %c0_i32_0 = arith.constant 0 : i32
    %c0_i32_1 = arith.constant 0 : i32
    return %c0_i32, %c0_i32_0 : i32, i32
  }
  func.func @transform_6(%arg0: i32) -> (i32, i32) {
    %c0_i32 = arith.constant 0 : i32
    %c0_i32_0 = arith.constant 0 : i32
    %c0_i32_1 = arith.constant 0 : i32
    return %c0_i32, %c0_i32_0 : i32, i32
  }
  func.func @transform_7(%arg0: i32) -> (i32, i32, i32) {
    %c0_i32 = arith.constant 0 : i32
    %c0_i32_0 = arith.constant 0 : i32
    %c0_i32_1 = arith.constant 0 : i32
    return %c0_i32, %arg0, %c0_i32_0 : i32, i32, i32
  }
}

</mosaic_0001>

<bundles_post_ra>
// kernel: tpu_custom_call.1
= control target key start
LH: loop header
LB: loop body
LE: loop exit
PB: predicated region body
PF: predicated region fallthrough
CT: control target
= control target key end

     0   :  { %12 = vsyncpa [#allocation3], 0  ;;  %s2018_s0 = inlined_call_operand.hbm [shape: f32[8,2,32], index: 0, kind: input, shape index: {}]   ;;  %s2019_s1 = inlined_call_operand.vmem [shape: f32[32,96], index: 1, kind: input, shape index: {}]   ;;  %s2020_s2 = inlined_call_operand.hbm [shape: f32[32,96], index: 2, kind: input, shape index: {}]   ;;  %s2021_s3 = inlined_call_operand.vmem [shape: f32[1,96], index: 3, kind: input, shape index: {}]   ;;  %s2022_s4 = inlined_call_operand.vmem [shape: f32[1,32], index: 4, kind: input, shape index: {}]   ;;  %s2023_s5 = inlined_call_operand.vmem [shape: f32[32,8], index: 5, kind: input, shape index: {}]   ;;  %s2024_s6 = inlined_call_operand.vmem [shape: f32[1,8], index: 6, kind: input, shape index: {}]   ;;  %s2025_s7 = inlined_call_operand.hbm [shape: f32[8,2,8], index: 7, kind: output, shape index: {}]  }
   0x1   :  { %13 = vsyncpa [#allocation6], 0 }
   0x2   :  { %14 = vsyncpa [#allocation4], 0  ;;  %s1696_s24 = smov [#allocation2]   ;;  %s1624_s28 = scalar_lea.hbm %s2018_s0, 256 }
   0x3   :  { %s20_s25 = sshll.u32 %s1696_s24, 4  ;;  %p1625_p0 = scmp.ne.s32.totalorder %s2018_s0, %s1624_s28  ;;  %s21_s25 = int_to_ptr.vmem [resolvable:$true] %s20_s25 }
   0x4   :  { %p1628_p1 = scmp.lt.u32.totalorder %s1624_s28, %s2018_s0 }
   0x6   :  { %p1630_p2 = pnand %p1628_p1, %p1625_p0 }
   0x8   :  { %1633 = shalt.err (!%p1630_p2)
}
   0x9   :  { %s1634_s10 = scalar_lea.vmem %s21_s25, 256  ;;  %p1639_p4 = scmp.lt.s32.totalorder %s21_s25, %s21_s25 }
   0xa   :  { %p1635_p3 = scmp.ne.s32.totalorder %s21_s25, %s1634_s10  ;;  %p1640_p5 = scmp.lt.s32.totalorder %s1634_s10, %s1634_s10 }
   0xc   :  { %p1641_p6 = por %p1640_p5, %p1639_p4 }
   0xe   :  { %p1642_p7 = pnand %p1641_p6, %p1635_p3 }
  0x10   :  { %1645 = shalt.err (!%p1642_p7)
}
  0x11   :  { %s1697_s11 = smov 32   ;;  %s1698_s12 = smov 2  }
  0x12   :  { %26 = dma.hbm_to_vmem [thread:$0]  %s2018_s0, 256, %s21_s25, [#allocation3], %s1697_s11, %s1697_s11, %s1698_s12  }
  0x13   :  { %s1699_s15 = smov [#allocation5]   ;;  %s1646_s19 = scalar_lea.hbm %s2020_s2, 512 }
  0x14   :  { %s34_s16 = sshll.u32 %s1699_s15, 4  ;;  %p1647_p8 = scmp.ne.s32.totalorder %s2020_s2, %s1646_s19  ;;  %s35_s16 = int_to_ptr.vmem [resolvable:$true] %s34_s16 }
  0x15   :  { %p1650_p9 = scmp.lt.u32.totalorder %s1646_s19, %s2020_s2 }
  0x17   :  { %p1652_p10 = pnand %p1650_p9, %p1647_p8 }
  0x19   :  { %1655 = shalt.err (!%p1652_p10)
}
  0x1a   :  { %s1656_s24 = scalar_lea.vmem %s35_s16, 512  ;;  %p1661_p12 = scmp.lt.s32.totalorder %s35_s16, %s35_s16 }
  0x1b   :  { %p1657_p11 = scmp.ne.s32.totalorder %s35_s16, %s1656_s24  ;;  %p1662_p13 = scmp.lt.s32.totalorder %s1656_s24, %s1656_s24 }
  0x1d   :  { %p1663_p0 = por %p1662_p13, %p1661_p12 }
  0x1f   :  { %p1664_p1 = pnand %p1663_p0, %p1657_p11 }
  0x21   :  { %1667 = shalt.err (!%p1664_p1)
}
  0x22   :  { %s1700_s0 = smov 128   ;;  %s1701_s25 = smov 8  }
  0x23   :  { %40 = dma.hbm_to_vmem [thread:$0]  %s2020_s2, 512, %s35_s16, [#allocation6], %s1700_s0, %s1700_s0, %s1701_s25  }
  0x24   :  { %1690 = dma.done.wait [#allocation3], 256  }
  0x25   :  { %1691 = vsyncadd [#allocation3], 4294967040 }
  0x26   :  { %1692 = dma.done.wait [#allocation6], 512  }
  0x27   :  { %1693 = vsyncadd [#allocation6], 4294966784  ;;  %v1702_v0 = vmov 0.0|0.0   ;;  %vm1703_vm0 = vmmov 0   ;;  %v1704_v1 = vmov 0.0   ;;  %v87_v2 = vlaneseq  ;;  %v63_v7 = vld [vmem:[%s2019_s1] sm:$0xff] }
  0x28   :  { %1499 = vmatprep.subr.bf16.mxu1 %v1702_v0  ;;  %1400 = vmatprep.mubr.msk.f32.mxu1 %vm1703_vm0, %v1704_v1  ;;  %v1705_v3 = vmov 1983009808   ;;  %v64_v8 = vld [vmem:[%s2019_s1 + $0x8] sm:$0xff]  ;;  %v196_v9 = vld [vmem:[#allocation5] sm:$0xff]  ;;  %v197_v11 = vld [vmem:[#allocation5 + $0x8] sm:$0xff]  ;;  %s1706_s15 = smov 64  }
  0x29   :  { %v85_v4 = vunpack.c.l.s4 %v1705_v3  ;;  %v88_v6 = vshrl.u32 %v87_v2, 7  ;;  %v1491_v10 = vpack.c.bf16 %v64_v8, %v63_v7  ;;  %v65_v12 = vld [vmem:[%s2019_s1 + $0x10] sm:$0xff]  ;;  %v66_v13 = vld [vmem:[%s2019_s1 + $0x18] sm:$0xff]  ;;  %v1791_v14 = vpack.c.bf16 %v197_v11, %v196_v9  ;;  %v198_v16 = vld [vmem:[#allocation5 + $0x10] sm:$0xff] }
  0x2a   :  { %v1495_v15 = vpack.c.bf16 %v66_v13, %v65_v12  ;;  %v199_v17 = vld [vmem:[#allocation5 + $0x18] sm:$0xff]  ;;  %v55_v18 = vld [vmem:[#allocation2] sm:$0x3]  ;;  %v56_v20 = vld [vmem:[#allocation2 + $0x2] sm:$0x3]  ;;  %vm116_vm1 = vcmask 261120  }
  0x2b   :  { %v86_v5 = vunpack.c.0.s8 %v85_v4  ;;  %1492 = vmatprep.subr.bf16.mxu0 %v1491_v10  ;;  %v57_v21 = vld [vmem:[#allocation2 + $0x4] sm:$0x3]  ;;  %v58_v22 = vld [vmem:[#allocation2 + $0x6] sm:$0x3]  ;;  %1501 = vmatpush3.bf16.msra.mxu1 %v1791_v14  ;;  %v1796_v23 = vpack.c.bf16 %v199_v17, %v198_v16  ;;  %v82_v24 = vcombine.low %v55_v18, %v56_v20  ;;  %v59_v26 = vld [vmem:[#allocation2 + $0x8] sm:$0x3] }
  0x2c   :  { %1494 = vmatpush3.bf16.msra.mxu0 %v1491_v10  ;;  %v83_v25 = vcombine.low %v57_v21, %v58_v22  ;;  %v60_v27 = vld [vmem:[#allocation2 + $0xa] sm:$0x3]  ;;  %v61_v28 = vld [vmem:[#allocation2 + $0xc] sm:$0x3]  ;;  %1502 = vmatprep.subr.bf16.mxu1 %v1702_v0  ;;  %v62_v29 = vld [vmem:[#allocation2 + $0xe] sm:$0x3] }
  0x2d   :  { %v1793_v19 = vsub.s32 %v86_v5, %v88_v6  ;;  %1496 = vmatprep.subr.bf16.mxu0 %v1495_v15  ;;  %v99_v30 = vcombine.low %v59_v26, %v60_v27  ;;  %v1310_v31 = vld [vmem:[%s2022_s4] ss:$0 sm:$0xff]  ;;  %v100_v34 = vcombine.low %v61_v28, %v62_v29  ;;  %vm1104_vm2 = vcmask 1041408  }
  0x2e   :  { %286 = vrot.lane.b32.xlu0 %v1310_v31, %s1706_s15  ;;  %v1307_v43 = vld [vmem:[%s2021_s3] ss:$0 sm:$0xff]  ;;  %s1707_s3 = smov 96   ;;  %vm1106_vm3 = vcmask 1043456   ;;  %vm1108_vm4 = vcmask 1045504   ;;  %vm1209_vm5 = vcmask 64512  }
  0x2f   :  { %v90_v32 = vrot.slane %v82_v24, %v1793_v19  ;;  %v97_v33 = vrot.slane %v83_v25, %v1793_v19  ;;  %v107_v35 = vrot.slane %v99_v30, %v1793_v19  ;;  %1504 = vmatpush3.bf16.msra.mxu1 %v1796_v23  ;;  %v114_v37 = vrot.slane %v100_v34, %v1793_v19 }
  0x30   :  { %1498 = vmatpush3.bf16.msra.mxu0 %v1495_v15  ;;  %1511 = vmatprep.subr.bf16.mxu1 %v1702_v0  ;;  %vm1280_vm6 = vcmask 58368  }
  0x31   :  { %v98_v36 = vcombine.low %v90_v32, %v97_v33  ;;  %1505 = vmatprep.subr.bf16.mxu0 %v1702_v0  ;;  %v115_v38 = vcombine.low %v107_v35, %v114_v37 }
  0x32   :  { %1401 = vmatmul.mubr.f32.vlgmr.msra.gmra.mrb[0].mxu1 %v1704_v1 }
  0x33   :  { %1389 = vmatprep.mubr.msk.f32.mxu0 %vm116_vm1, %v98_v36  ;;  %1513 = vmatpush3.bf16.msra.mxu1 %v1791_v14 }
  0x34   :  { %1390 = vmatmul.mubr.msk.f32.vlgmr.msra.gmra.mrb[0].mxu0 %vm116_vm1, %v115_v38  ;;  %1514 = vmatprep.subr.bf16.mxu1 %v1702_v0 }
  0x35   :  { %1507 = vmatpush3.bf16.msra.mxu0 %v1791_v14  ;;  %1411 = vmatprep.mubr.msk.f32.mxu0 %vm1703_vm0, %v1704_v1 }
  0x36   :  { %1508 = vmatprep.subr.bf16.mxu0 %v1702_v0  ;;  %1422 = vmatprep.mubr.msk.f32.mxu1 %vm1703_vm0, %v1704_v1 }
  0x37   :  { %1516 = vmatpush3.bf16.msra.mxu1 %v1796_v23 }
  0x38   :  { %1523 = vmatprep.subr.bf16.mxu1 %v1702_v0 }
  0x39   :  { %1510 = vmatpush3.bf16.msra.mxu0 %v1796_v23 }
  0x3a   :  { %1517 = vmatprep.subr.bf16.mxu0 %v1702_v0 }
  0xa0   :  { %v1825_v39 = vpop.permute.xlu0 %286 }
 0x105   :  { %v275_v40 = vpop.f32.mrb[0].mxu1 }
 0x106   :  { %v289_v41 = vadd.f32 %v1825_v39, %v275_v40  ;;  %v1402_v44 = vpop.f32.mrb[1].mxu1 }
 0x107   :  { %v1391_v42 = vpop.f32.mrb[0].mxu0 }
 0x108   :  { %v1831_v45 = vadd.f32 %v1391_v42, %v1307_v43  ;;  %v187_v46 = vpop.f32.mrb[1].mxu0  ;;  %291 = vrot.lane.b32.xlu0 %v289_v41, %s1706_s15 }
 0x109   :  { %v1834_v47 = vadd.f32 %v1307_v43, %v187_v46 }
 0x10b   :  { %v279_v48 = vadd.f32 %v275_v40, %v1834_v47 }
 0x10d   :  { %v1311_v49 = vmul.f32 -1.442695, %v279_v48 }
 0x10f   :  { %1568 = vpow2.f32 %v1311_v49 }
 0x119   :  { %v1569_v50 = vpop.eup %1568 }
 0x11a   :  { %v283_v51 = vadd.f32 1.0, %v1569_v50 }
 0x11c   :  { %1570 = vrcp.f32 %v283_v51 }
 0x126   :  { %v1571_v52 = vpop.eup %1570 }
 0x17a   :  { %v292_v53 = vpop.permute.xlu0 %291 }
 0x17b   :  { %v294_v54 = vmul.f32 %v1571_v52, %v292_v53 }
 0x17d   :  { %296 = vrot.lane.b32.xlu1 %v294_v54, %s1706_s15 }
 0x1ef   :  { %v297_v55 = vpop.permute.xlu1 %296 }
 0x1f0   :  { %v299_v56 = vadd.f32 %v297_v55, %v1834_v47 }
 0x1f2   :  { %1572 = vtanh.f32 %v299_v56 }
 0x1fc   :  { %v1573_v57 = vpop.eup %1572 }
 0x1fd   :  { %v301_v58 = vsub.f32 0.0, %v1573_v57 }
 0x1ff   :  { %303 = vrot.lane.b32.xlu1 %v301_v58, %s1707_s3 }
 0x271   :  { %v304_v59 = vpop.permute.xlu1 %303 }
 0x272   :  { %v306_v60 = vmul.f32 %v1571_v52, %v304_v59 }
 0x274   :  { %308 = vrot.lane.b32.xlu0 %v306_v60, %s1697_s11 }
 0x2e6   :  { %v309_v61 = vpop.permute.xlu0 %308 }
 0x2e7   :  { %v1841_v62 = vadd.f32 %v1573_v57, %v309_v61 }
 0x2e9   :  { %313 = vrot.lane.b32.xlu1 %v1841_v62, %s1706_s15 }
 0x35b   :  { %v314_v63 = vpop.permute.xlu1 %313 }
 0x35c   :  { %1412 = vmatmul.mubr.msk.f32.vlgmr.msra.gmra.mrb[2].mxu0 %vm116_vm1, %v314_v63 }
 0x35d   :  { %1519 = vmatpush3.bf16.msra.mxu0 %v1791_v14  ;;  %1433 = vmatprep.mubr.msk.f32.mxu0 %vm1703_vm0, %v1704_v1 }
 0x35e   :  { %1520 = vmatprep.subr.bf16.mxu0 %v1702_v0 }
 0x361   :  { %1522 = vmatpush3.bf16.msra.mxu0 %v1796_v23 }
 0x362   :  { %1529 = vmatprep.subr.bf16.mxu0 %v1702_v0 }
 0x42f   :  { %v383_v2 = vpop.f32.mrb[2].mxu0 }
 0x430   :  { %v397_v3 = vadd.f32 %v383_v2, %v1825_v39  ;;  %v1413_v4 = vpop.f32.mrb[3].mxu0  ;;  %v388_v6 = vrot.slane %v383_v2, 6 }
 0x432   :  { %v399_v5 = vrot.slane %v397_v3, 6  ;;  %v390_v7 = vadd.f32 %v388_v6, %v1834_v47 }
 0x434   :  { %400 = vrot.lane.b32.xlu0 %v399_v5, %s1706_s15  ;;  %v1313_v8 = vmul.f32 -1.442695, %v390_v7 }
 0x436   :  { %1574 = vpow2.f32 %v1313_v8 }
 0x440   :  { %v1575_v9 = vpop.eup %1574 }
 0x441   :  { %v394_v10 = vadd.f32 1.0, %v1575_v9 }
 0x443   :  { %1576 = vrcp.f32 %v394_v10 }
 0x44d   :  { %v1577_v11 = vpop.eup %1576 }
 0x4a6   :  { %v401_v12 = vpop.permute.xlu0 %400 }
 0x4a7   :  { %v403_v13 = vmul.f32 %v1577_v11, %v401_v12 }
 0x4a9   :  { %405 = vrot.lane.b32.xlu1 %v403_v13, %s1706_s15 }
 0x51b   :  { %v406_v15 = vpop.permute.xlu1 %405 }
 0x51c   :  { %v408_v16 = vadd.f32 %v406_v15, %v1834_v47 }
 0x51e   :  { %1578 = vtanh.f32 %v408_v16 }
 0x528   :  { %v1579_v17 = vpop.eup %1578 }
 0x529   :  { %v411_v18 = vrot.slane %v1579_v17, 2 }
 0x52b   :  { %v413_v20 = vsub.f32 %v1841_v62, %v411_v18 }
 0x52d   :  { %v415_v21 = vrot.slane %v413_v20, 6 }
 0x52f   :  { %416 = vrot.lane.b32.xlu0 %v415_v21, %s1707_s3 }
 0x5a1   :  { %v417_v22 = vpop.permute.xlu0 %416 }
 0x5a2   :  { %v419_v24 = vmul.f32 %v1577_v11, %v417_v22 }
 0x5a4   :  { %421 = vrot.lane.b32.xlu1 %v419_v24, %s1697_s11 }
 0x616   :  { %v422_v25 = vpop.permute.xlu1 %421 }
 0x617   :  { %v1860_v26 = vadd.f32 %v1579_v17, %v422_v25 }
 0x619   :  { %v426_v27 = vrot.slane %v1860_v26, 2 }
 0x61b   :  { %427 = vrot.lane.b32.xlu0 %v426_v27, %s1706_s15 }
 0x68d   :  { %v428_v28 = vpop.permute.xlu0 %427 }
 0x68e   :  { %1423 = vmatmul.mubr.msk.f32.vlgmr.msra.gmra.mrb[2].mxu1 %vm116_vm1, %v428_v28 }
 0x68f   :  { %1525 = vmatpush3.bf16.msra.mxu1 %v1791_v14  ;;  %1444 = vmatprep.mubr.msk.f32.mxu1 %vm1703_vm0, %v1704_v1 }
 0x690   :  { %1526 = vmatprep.subr.bf16.mxu1 %v1702_v0 }
 0x693   :  { %1528 = vmatpush3.bf16.msra.mxu1 %v1796_v23 }
 0x694   :  { %1535 = vmatprep.subr.bf16.mxu1 %v1702_v0 }
 0x761   :  { %v497_v29 = vpop.f32.mrb[2].mxu1 }
 0x762   :  { %v511_v30 = vadd.f32 %v497_v29, %v1825_v39  ;;  %v1424_v31 = vpop.f32.mrb[3].mxu1  ;;  %v502_v33 = vrot.slane %v497_v29, 4 }
 0x764   :  { %v513_v32 = vrot.slane %v511_v30, 4  ;;  %v504_v34 = vadd.f32 %v502_v33, %v1834_v47 }
 0x766   :  { %514 = vrot.lane.b32.xlu1 %v513_v32, %s1706_s15  ;;  %v1315_v35 = vmul.f32 -1.442695, %v504_v34 }
 0x768   :  { %1580 = vpow2.f32 %v1315_v35 }
 0x772   :  { %v1581_v36 = vpop.eup %1580 }
 0x773   :  { %v508_v37 = vadd.f32 1.0, %v1581_v36 }
 0x775   :  { %1582 = vrcp.f32 %v508_v37 }
 0x77f   :  { %v1583_v38 = vpop.eup %1582 }
 0x7d8   :  { %v515_v40 = vpop.permute.xlu1 %514 }
 0x7d9   :  { %v517_v41 = vmul.f32 %v1583_v38, %v515_v40 }
 0x7db   :  { %519 = vrot.lane.b32.xlu0 %v517_v41, %s1706_s15 }
 0x84d   :  { %v520_v42 = vpop.permute.xlu0 %519 }
 0x84e   :  { %v522_v43 = vadd.f32 %v520_v42, %v1834_v47 }
 0x850   :  { %1584 = vtanh.f32 %v522_v43 }
 0x85a   :  { %v1585_v44 = vpop.eup %1584 }
 0x85b   :  { %v525_v46 = vrot.slane %v1585_v44, 2 }
 0x85d   :  { %v527_v48 = vsub.f32 %v1860_v26, %v525_v46 }
 0x85f   :  { %v529_v49 = vrot.slane %v527_v48, 6 }
 0x861   :  { %530 = vrot.lane.b32.xlu1 %v529_v49, %s1707_s3 }
 0x8d3   :  { %v531_v50 = vpop.permute.xlu1 %530 }
 0x8d4   :  { %v533_v51 = vmul.f32 %v1583_v38, %v531_v50 }
 0x8d6   :  { %535 = vrot.lane.b32.xlu0 %v533_v51, %s1697_s11 }
 0x948   :  { %v536_v52 = vpop.permute.xlu0 %535 }
 0x949   :  { %v1879_v53 = vadd.f32 %v1585_v44, %v536_v52 }
 0x94b   :  { %v540_v54 = vrot.slane %v1879_v53, 4 }
 0x94d   :  { %541 = vrot.lane.b32.xlu1 %v540_v54, %s1706_s15 }
 0x9bf   :  { %v542_v55 = vpop.permute.xlu1 %541 }
 0x9c0   :  { %1434 = vmatmul.mubr.msk.f32.vlgmr.msra.gmra.mrb[4].mxu0 %vm116_vm1, %v542_v55 }
 0x9c1   :  { %1531 = vmatpush3.bf16.msra.mxu0 %v1791_v14  ;;  %1455 = vmatprep.mubr.msk.f32.mxu0 %vm1703_vm0, %v1704_v1 }
 0x9c2   :  { %1532 = vmatprep.subr.bf16.mxu0 %v1702_v0 }
 0x9c5   :  { %1534 = vmatpush3.bf16.msra.mxu0 %v1796_v23 }
 0x9c6   :  { %1541 = vmatprep.subr.bf16.mxu0 %v1702_v0 }
 0xa93   :  { %v611_v56 = vpop.f32.mrb[4].mxu0 }
 0xa94   :  { %v625_v57 = vadd.f32 %v611_v56, %v1825_v39  ;;  %v1435_v58 = vpop.f32.mrb[5].mxu0  ;;  %v616_v60 = vrot.slane %v611_v56, 2 }
 0xa96   :  { %v627_v59 = vrot.slane %v625_v57, 2  ;;  %v618_v61 = vadd.f32 %v616_v60, %v1834_v47 }
 0xa98   :  { %628 = vrot.lane.b32.xlu0 %v627_v59, %s1706_s15  ;;  %v1317_v63 = vmul.f32 -1.442695, %v618_v61 }
 0xa9a   :  { %1586 = vpow2.f32 %v1317_v63 }
 0xaa4   :  { %v1587_v2 = vpop.eup %1586 }
 0xaa5   :  { %v622_v3 = vadd.f32 1.0, %v1587_v2 }
 0xaa7   :  { %1588 = vrcp.f32 %v622_v3 }
 0xab1   :  { %v1589_v4 = vpop.eup %1588 }
 0xb0a   :  { %v629_v5 = vpop.permute.xlu0 %628 }
 0xb0b   :  { %v631_v6 = vmul.f32 %v1589_v4, %v629_v5 }
 0xb0d   :  { %633 = vrot.lane.b32.xlu1 %v631_v6, %s1706_s15 }
 0xb7f   :  { %v634_v7 = vpop.permute.xlu1 %633 }
 0xb80   :  { %v636_v8 = vadd.f32 %v634_v7, %v1834_v47 }
 0xb82   :  { %1590 = vtanh.f32 %v636_v8 }
 0xb8c   :  { %v1591_v9 = vpop.eup %1590 }
 0xb8d   :  { %v639_v10 = vrot.slane %v1591_v9, 2 }
 0xb8f   :  { %v641_v11 = vsub.f32 %v1879_v53, %v639_v10 }
 0xb91   :  { %v643_v12 = vrot.slane %v641_v11, 6 }
 0xb93   :  { %644 = vrot.lane.b32.xlu0 %v643_v12, %s1707_s3 }
 0xc05   :  { %v645_v13 = vpop.permute.xlu0 %644 }
 0xc06   :  { %v647_v15 = vmul.f32 %v1589_v4, %v645_v13 }
 0xc08   :  { %649 = vrot.lane.b32.xlu1 %v647_v15, %s1697_s11 }
 0xc7a   :  { %v650_v16 = vpop.permute.xlu1 %649 }
 0xc7b   :  { %v1898_v17 = vadd.f32 %v1591_v9, %v650_v16 }
 0xc7d   :  { %v654_v18 = vrot.slane %v1898_v17, 6 }
 0xc7f   :  { %655 = vrot.lane.b32.xlu0 %v654_v18, %s1706_s15 }
 0xcf1   :  { %v656_v47 = vpop.permute.xlu0 %655 }
 0xcf2   :  { %1445 = vmatmul.mubr.msk.f32.vlgmr.msra.gmra.mrb[4].mxu1 %vm116_vm1, %v656_v47 }
 0xcf3   :  { %1537 = vmatpush3.bf16.msra.mxu1 %v1791_v14  ;;  %1466 = vmatprep.mubr.msk.f32.mxu1 %vm1703_vm0, %v1704_v1 }
 0xcf4   :  { %1538 = vmatprep.subr.bf16.mxu1 %v1702_v0 }
 0xcf7   :  { %1540 = vmatpush3.bf16.msra.mxu1 %v1796_v23 }
 0xdc5   :  { %v725_v20 = vpop.f32.mrb[4].mxu1 }
 0xdc6   :  { %v736_v21 = vadd.f32 %v725_v20, %v1825_v39  ;;  %v1446_v22 = vpop.f32.mrb[5].mxu1  ;;  %v729_v24 = vadd.f32 %v725_v20, %v1831_v45 }
 0xdc8   :  { %738 = vrot.lane.b32.xlu1 %v736_v21, %s1706_s15  ;;  %v1319_v25 = vmul.f32 -1.442695, %v729_v24 }
 0xdca   :  { %1592 = vpow2.f32 %v1319_v25 }
 0xdd4   :  { %v1593_v27 = vpop.eup %1592 }
 0xdd5   :  { %v733_v28 = vadd.f32 1.0, %v1593_v27 }
 0xdd7   :  { %1594 = vrcp.f32 %v733_v28 }
 0xde1   :  { %v1595_v29 = vpop.eup %1594 }
 0xe3a   :  { %v739_v30 = vpop.permute.xlu1 %738 }
 0xe3b   :  { %v741_v31 = vmul.f32 %v1595_v29, %v739_v30 }
 0xe3d   :  { %743 = vrot.lane.b32.xlu0 %v741_v31, %s1706_s15 }
 0xeaf   :  { %v744_v32 = vpop.permute.xlu0 %743 }
 0xeb0   :  { %v746_v33 = vadd.f32 %v744_v32, %v1831_v45 }
 0xeb2   :  { %1596 = vtanh.f32 %v746_v33 }
 0xebc   :  { %v1597_v34 = vpop.eup %1596 }
 0xebd   :  { %v749_v35 = vrot.slane %v1597_v34, 2 }
 0xebf   :  { %v751_v36 = vsub.f32 %v1898_v17, %v749_v35 }
 0xec1   :  { %v753_v37 = vrot.slane %v751_v36, 6 }
 0xec3   :  { %754 = vrot.lane.b32.xlu1 %v753_v37, %s1707_s3 }
 0xf35   :  { %v755_v38 = vpop.permute.xlu1 %754 }
 0xf36   :  { %v757_v40 = vmul.f32 %v1595_v29, %v755_v38 }
 0xf38   :  { %759 = vrot.lane.b32.xlu0 %v757_v40, %s1697_s11 }
 0xfaa   :  { %v760_v41 = vpop.permute.xlu0 %759 }
 0xfab   :  { %v1916_v42 = vadd.f32 %v1597_v34, %v760_v41 }
 0xfad   :  { %764 = vrot.lane.b32.xlu1 %v1916_v42, %s1706_s15 }
0x101f   :  { %v765_v43 = vpop.permute.xlu1 %764 }
0x1020   :  { %1456 = vmatmul.mubr.msk.f32.vlgmr.msra.gmra.mrb[6].mxu0 %vm116_vm1, %v765_v43 }
0x1021   :  { %1543 = vmatpush3.bf16.msra.mxu0 %v1791_v14  ;;  %1477 = vmatprep.mubr.msk.f32.mxu0 %vm1703_vm0, %v1704_v1 }
0x1022   :  { %1544 = vmatprep.subr.bf16.mxu0 %v1702_v0 }
0x1025   :  { %1546 = vmatpush3.bf16.msra.mxu0 %v1796_v23 }
0x10f3   :  { %v834_v44 = vpop.f32.mrb[6].mxu0 }
0x10f4   :  { %v848_v46 = vadd.f32 %v834_v44, %v1825_v39  ;;  %v1457_v48 = vpop.f32.mrb[7].mxu0  ;;  %v839_v50 = vrot.slane %v834_v44, 6 }
0x10f6   :  { %v850_v49 = vrot.slane %v848_v46, 6  ;;  %v841_v51 = vadd.f32 %v839_v50, %v1831_v45 }
0x10f8   :  { %851 = vrot.lane.b32.xlu0 %v850_v49, %s1706_s15  ;;  %v1321_v52 = vmul.f32 -1.442695, %v841_v51 }
0x10fa   :  { %1598 = vpow2.f32 %v1321_v52 }
0x1104   :  { %v1599_v14 = vpop.eup %1598 }
0x1105   :  { %v845_v54 = vadd.f32 1.0, %v1599_v14 }
0x1107   :  { %1600 = vrcp.f32 %v845_v54 }
0x1111   :  { %v1601_v1 = vpop.eup %1600 }
0x116a   :  { %v852_v55 = vpop.permute.xlu0 %851 }
0x116b   :  { %v854_v0 = vmul.f32 %v1601_v1, %v852_v55 }
0x116d   :  { %856 = vrot.lane.b32.xlu1 %v854_v0, %s1706_s15  ;;  %v1113_v0 = vld [vmem:[%s2023_s5] sm:$0xff] }
0x11df   :  { %v857_v23 = vpop.permute.xlu1 %856 }
0x11e0   :  { %v859_v56 = vadd.f32 %v857_v23, %v1831_v45  ;;  %v1114_v23 = vld [vmem:[%s2023_s5 + $0x8] sm:$0xff] }
0x11e2   :  { %1602 = vtanh.f32 %v859_v56 }
0x11ec   :  { %v1603_v57 = vpop.eup %1602 }
0x11ed   :  { %v862_v58 = vrot.slane %v1603_v57, 2 }
0x11ef   :  { %v864_v59 = vsub.f32 %v1916_v42, %v862_v58 }
0x11f1   :  { %v866_v60 = vrot.slane %v864_v59, 6 }
0x11f3   :  { %867 = vrot.lane.b32.xlu0 %v866_v60, %s1707_s3 }
0x1265   :  { %v868_v61 = vpop.permute.xlu0 %867 }
0x1266   :  { %v870_v63 = vmul.f32 %v1601_v1, %v868_v61  ;;  %v1105_v1 = vsel %vm1104_vm2, %v1841_v62, %v1860_v26  ;;  %v1115_v62 = vld [vmem:[%s2023_s5 + $0x10] sm:$0xff]  ;;  %v1547_v26 = vpack.c.bf16 %v1114_v23, %v1113_v0 }
0x1267   :  { %v1107_v55 = vsel %vm1106_vm3, %v1105_v1, %v1879_v53  ;;  %v1116_v53 = vld [vmem:[%s2023_s5 + $0x18] sm:$0xff] }
0x1268   :  { %872 = vrot.lane.b32.xlu1 %v870_v63, %s1697_s11  ;;  %1548 = vmatprep.subr.bf16.mxu1 %v1547_v26 }
0x12da   :  { %v873_v2 = vpop.permute.xlu1 %872 }
0x12db   :  { %v1934_v3 = vadd.f32 %v1603_v57, %v873_v2 }
0x12dd   :  { %v877_v4 = vrot.slane %v1934_v3, 2  ;;  %v1110_v60 = vsel %vm1104_vm2, %v1916_v42, %v1934_v3 }
0x12df   :  { %878 = vrot.lane.b32.xlu0 %v877_v4, %s1706_s15 }
0x1351   :  { %v879_v5 = vpop.permute.xlu0 %878 }
0x1352   :  { %1467 = vmatmul.mubr.msk.f32.vlgmr.msra.gmra.mrb[6].mxu1 %vm116_vm1, %v879_v5  ;;  %v1326_v5 = vld [vmem:[%s2024_s6] ss:$0 sm:$0xff]  ;;  %s1708_s6 = smov [#allocation7]  }
0x1353   :  { %1550 = vmatpush3.bf16.msra.mxu1 %v1547_v26  ;;  %s1294_s25 = sshll.u32 %s1708_s6, 4  ;;  %s1295_s25 = int_to_ptr.vmem [resolvable:$true] %s1294_s25 }
0x1354   :  { %s1668_s26 = scalar_lea.vmem %s1295_s25, 256  ;;  %p1673_p3 = scmp.lt.s32.totalorder %s1295_s25, %s1295_s25 }
0x1355   :  { %p1669_p2 = scmp.ne.s32.totalorder %s1295_s25, %s1668_s26  ;;  %p1674_p4 = scmp.lt.s32.totalorder %s1668_s26, %s1668_s26 }
0x1357   :  { %p1675_p5 = por %p1674_p4, %p1673_p3 }
0x1359   :  { %p1676_p6 = pnand %p1675_p5, %p1669_p2 }
0x1425   :  { %v948_v6 = vpop.f32.mrb[6].mxu1 }
0x1426   :  { %v962_v7 = vadd.f32 %v948_v6, %v1825_v39  ;;  %v1468_v8 = vpop.f32.mrb[7].mxu1  ;;  %v953_v10 = vrot.slane %v948_v6, 4 }
0x1428   :  { %v964_v9 = vrot.slane %v962_v7, 4  ;;  %v955_v11 = vadd.f32 %v953_v10, %v1831_v45 }
0x142a   :  { %965 = vrot.lane.b32.xlu1 %v964_v9, %s1706_s15  ;;  %v1323_v12 = vmul.f32 -1.442695, %v955_v11 }
0x142c   :  { %1604 = vpow2.f32 %v1323_v12 }
0x1436   :  { %v1605_v13 = vpop.eup %1604 }
0x1437   :  { %v959_v15 = vadd.f32 1.0, %v1605_v13 }
0x1439   :  { %1606 = vrcp.f32 %v959_v15 }
0x1443   :  { %v1607_v16 = vpop.eup %1606 }
0x149c   :  { %v966_v18 = vpop.permute.xlu1 %965 }
0x149d   :  { %v968_v47 = vmul.f32 %v1607_v16, %v966_v18 }
0x149f   :  { %970 = vrot.lane.b32.xlu0 %v968_v47, %s1706_s15 }
0x1511   :  { %v971_v20 = vpop.permute.xlu0 %970 }
0x1512   :  { %v973_v21 = vadd.f32 %v971_v20, %v1831_v45 }
0x1514   :  { %1608 = vtanh.f32 %v973_v21 }
0x151e   :  { %v1609_v22 = vpop.eup %1608 }
0x151f   :  { %v976_v24 = vrot.slane %v1609_v22, 2 }
0x1521   :  { %v978_v25 = vsub.f32 %v1934_v3, %v976_v24 }
0x1523   :  { %v980_v27 = vrot.slane %v978_v25, 6 }
0x1525   :  { %981 = vrot.lane.b32.xlu1 %v980_v27, %s1707_s3 }
0x1597   :  { %v982_v28 = vpop.permute.xlu1 %981 }
0x1598   :  { %v984_v29 = vmul.f32 %v1607_v16, %v982_v28 }
0x159a   :  { %986 = vrot.lane.b32.xlu0 %v984_v29, %s1697_s11 }
0x160c   :  { %v987_v30 = vpop.permute.xlu0 %986 }
0x160d   :  { %v989_v31 = vadd.f32 %v1609_v22, %v987_v30 }
0x160f   :  { %v991_v32 = vrot.slane %v989_v31, 4  ;;  %v1111_v63 = vsel %vm1106_vm3, %v1110_v60, %v989_v31 }
0x1611   :  { %992 = vrot.lane.b32.xlu1 %v991_v32, %s1706_s15 }
0x1683   :  { %v993_v33 = vpop.permute.xlu1 %992 }
0x1684   :  { %1478 = vmatmul.mubr.msk.f32.vlgmr.msra.gmra.mrb[8].mxu0 %vm116_vm1, %v993_v33 }
0x1757   :  { %v1062_v34 = vpop.f32.mrb[8].mxu0 }
0x1758   :  { %v1076_v35 = vadd.f32 %v1062_v34, %v1825_v39  ;;  %v1479_v36 = vpop.f32.mrb[9].mxu0  ;;  %v1067_v38 = vrot.slane %v1062_v34, 2 }
0x175a   :  { %v1078_v37 = vrot.slane %v1076_v35, 2  ;;  %v1069_v40 = vadd.f32 %v1067_v38, %v1831_v45 }
0x175c   :  { %1079 = vrot.lane.b32.xlu0 %v1078_v37, %s1706_s15  ;;  %v1325_v41 = vmul.f32 -1.442695, %v1069_v40 }
0x175e   :  { %1610 = vpow2.f32 %v1325_v41 }
0x1768   :  { %v1611_v43 = vpop.eup %1610 }
0x1769   :  { %v1073_v44 = vadd.f32 1.0, %v1611_v43 }
0x176b   :  { %1612 = vrcp.f32 %v1073_v44 }
0x1775   :  { %v1613_v46 = vpop.eup %1612 }
0x17ce   :  { %v1080_v48 = vpop.permute.xlu0 %1079 }
0x17cf   :  { %v1082_v49 = vmul.f32 %v1613_v46, %v1080_v48 }
0x17d1   :  { %1084 = vrot.lane.b32.xlu1 %v1082_v49, %s1706_s15 }
0x1843   :  { %v1085_v50 = vpop.permute.xlu1 %1084 }
0x1844   :  { %v1087_v39 = vadd.f32 %v1085_v50, %v1831_v45  ;;  %v1109_v45 = vsel %vm1108_vm4, %v1107_v55, %v1898_v17  ;;  %v1551_v17 = vpack.c.bf16 %v1116_v53, %v1115_v62 }
0x1846   :  { %1614 = vtanh.f32 %v1087_v39  ;;  %1552 = vmatprep.subr.bf16.mxu1 %v1551_v17 }
0x1847   :  { %1554 = vmatpush3.bf16.msra.mxu1 %v1551_v17 }
0x1850   :  { %v1615_v51 = vpop.eup %1614 }
0x1851   :  { %v1090_v52 = vrot.slane %v1615_v51, 2 }
0x1853   :  { %v1092_v14 = vsub.f32 %v989_v31, %v1090_v52 }
0x1855   :  { %v1094_v54 = vrot.slane %v1092_v14, 6 }
0x1857   :  { %1095 = vrot.lane.b32.xlu0 %v1094_v54, %s1707_s3 }
0x185b   :  { %1126 = vrot.lane.b32.xlu0 %v1109_v45, %s1706_s15 }
0x18c9   :  { %v1096_v56 = vpop.permute.xlu0 %1095 }
0x18ca   :  { %v1098_v57 = vmul.f32 %v1613_v46, %v1096_v56 }
0x18cc   :  { %1100 = vrot.lane.b32.xlu1 %v1098_v57, %s1697_s11 }
0x18cd   :  { %v1127_v58 = vpop.permute.xlu0 %1126 }
0x18ce   :  { %1488 = vmatprep.mubr.msk.f32.mxu1 %vm116_vm1, %v1127_v58 }
0x193e   :  { %v1101_v59 = vpop.permute.xlu1 %1100 }
0x193f   :  { %v1103_v61 = vadd.f32 %v1615_v51, %v1101_v59 }
0x1941   :  { %v1112_v2 = vsel %vm1108_vm4, %v1111_v63, %v1103_v61 }
0x1942   :  { %1128 = vrot.lane.b32.xlu1 %v1112_v2, %s1706_s15 }
0x19b4   :  { %v1129_v4 = vpop.permute.xlu1 %1128 }
0x19b5   :  { %1489 = vmatmul.mubr.msk.f32.vlgmr.msra.gmra.mrb[8].mxu1 %vm116_vm1, %v1129_v4 }
0x1a88   :  { %v1490_v6 = vpop.f32.mrb[8].mxu1 }
0x1a89   :  { %v1206_v7 = vadd.f32 %v1490_v6, %v1326_v5  ;;  %v1200_v8 = vpop.f32.mrb[9].mxu1 }
0x1a8a   :  { %v1201_v9 = vadd.f32 %v1326_v5, %v1200_v8 }
0x1a8b   :  { %v1213_v42 = vsel %vm1209_vm5, %v1206_v7, -inf }
0x1a8c   :  { %1214 = vmax.xlane.f32.xlu1 %v1213_v42  ;;  %v1210_v3 = vsel %vm1209_vm5, %v1201_v9, -inf }
0x1a8d   :  { %1211 = vmax.xlane.f32.xlu0 %v1210_v3 }
0x1b19   :  { %v1215_v10 = vpop.xlane.xlu1 %1214 }
0x1b1a   :  { %v1217_v11 = vsub.f32 %v1206_v7, %v1215_v10  ;;  %v1212_v12 = vpop.xlane.xlu0 %1211 }
0x1b1b   :  { %v1216_v13 = vsub.f32 %v1201_v9, %v1212_v12 }
0x1b1c   :  { %v1220_v15 = vmul.f32 1.442695, %v1217_v11 }
0x1b1d   :  { %v1218_v16 = vmul.f32 1.442695, %v1216_v13 }
0x1b1f   :  { %1616 = vpow2.f32 %v1218_v16 }
0x1b20   :  { %1618 = vpow2.f32 %v1220_v15 }
0x1b29   :  { %v1617_v18 = vpop.eup %1616 }
0x1b2a   :  { %v1222_v47 = vsel %vm1209_vm5, %v1617_v18, 0.0  ;;  %v1619_v20 = vpop.eup %1618 }
0x1b2b   :  { %1223 = vadd.xlane.f32.xlu0 %v1222_v47  ;;  %v1225_v21 = vsel %vm1209_vm5, %v1619_v20, 0.0 }
0x1b2f   :  { %1226 = vadd.xlane.f32.xlu0 %v1225_v21 }
0x1bb8   :  { %v1224_v22 = vpop.xlane.xlu0 %1223 }
0x1bb9   :  { %1620 = vlog2.f32 %v1224_v22 }
0x1bbc   :  { %v1227_v24 = vpop.xlane.xlu0 %1226 }
0x1bbd   :  { %1622 = vlog2.f32 %v1227_v24 }
0x1bc3   :  { %v1621_v25 = vpop.eup %1620 }
0x1bc4   :  { %v1229_v27 = vmul.f32 0.6931472, %v1621_v25 }
0x1bc6   :  { %v1232_v28 = vadd.f32 %v1229_v27, %v1212_v12 }
0x1bc7   :  { %v1623_v29 = vpop.eup %1622 }
0x1bc8   :  { %v1234_v30 = vsub.f32 %v1201_v9, %v1232_v28  ;;  %v1231_v31 = vmul.f32 0.6931472, %v1623_v29 }
0x1bca   :  { %v1238_v32 = vcombine.high %v1234_v30, %v1234_v30  ;;  %v1245_v33 = vrot.slane %v1234_v30, %v1793_v19  ;;  %v1233_v34 = vadd.f32 %v1231_v31, %v1215_v10 }
0x1bcc   :  { %v1252_v35 = vrot.slane %v1238_v32, %v1793_v19  ;;  %v1253_v36 = vcombine.high %v1245_v33, %v1245_v33  ;;  %1281 = vst.msk [vmem:[#allocation7] sm:$0x3] %vm1280_vm6, %v1245_v33  ;;  %v1235_v37 = vsub.f32 %v1206_v7, %v1233_v34 }
0x1bce   :  { %v1254_v38 = vcombine.high %v1252_v35, %v1252_v35  ;;  %1282 = vst.msk [vmem:[#allocation7 + $0x2] sm:$0x3] %vm1280_vm6, %v1253_v36  ;;  %1283 = vst.msk [vmem:[#allocation7 + $0x4] sm:$0x3] %vm1280_vm6, %v1252_v35  ;;  %v1255_v40 = vcombine.high %v1235_v37, %v1235_v37  ;;  %v1262_v41 = vrot.slane %v1235_v37, %v1793_v19 }
0x1bd0   :  { %1284 = vst.msk [vmem:[#allocation7 + $0x6] sm:$0x3] %vm1280_vm6, %v1254_v38  ;;  %v1269_v43 = vrot.slane %v1255_v40, %v1793_v19  ;;  %v1270_v44 = vcombine.high %v1262_v41, %v1262_v41  ;;  %1285 = vst.msk [vmem:[#allocation7 + $0x8] sm:$0x3] %vm1280_vm6, %v1262_v41 }
0x1bd2   :  { %v1271_v46 = vcombine.high %v1269_v43, %v1269_v43  ;;  %1286 = vst.msk [vmem:[#allocation7 + $0xa] sm:$0x3] %vm1280_vm6, %v1270_v44  ;;  %1287 = vst.msk [vmem:[#allocation7 + $0xc] sm:$0x3] %vm1280_vm6, %v1269_v43 }
0x1bd4   :  { %1288 = vst.msk [vmem:[#allocation7 + $0xe] sm:$0x3] %vm1280_vm6, %v1271_v46 }
0x1bd5   :  { %1679 = shalt.err (!%p1676_p6)
}
0x1bd6   :  { %s1680_s29 = scalar_lea.hbm %s2025_s7, 256 }
0x1bd7   :  { %p1681_p7 = scmp.ne.s32.totalorder %s2025_s7, %s1680_s29  ;;  %p1684_p8 = scmp.lt.u32.totalorder %s1680_s29, %s2025_s7 }
0x1bd9   :  { %p1686_p9 = pnand %p1684_p8, %p1681_p7 }
0x1bdb   :  { %1689 = shalt.err (!%p1686_p9)
}
0x1bdc   :  { %1300 = dma.vmem_to_hbm [thread:$0]  %s1295_s25, 256, %s2025_s7, [#allocation4], %s1697_s11, %s1697_s11, %s1698_s12  }
0x1bdd   :  { %1694 = dma.done.wait [#allocation4], 256  }
0x1bde   :  { %1695 = vsyncadd [#allocation4], 4294967040 }
0x1bdf   :  { %1304 = vsyncpa [#allocation3], 1 }
0x1be0   :  { %1305 = vsyncpa [#allocation6], 1 }
0x1be1   :  { %1306 = vsyncpa [#allocation4], 1 }

</bundles_post_ra>
